<compile_context>
chip_gen: v6e
topology: v6e:2x2x1
jax: 0.10.0
libtpu: 0.0.40
codegen_flags: <defaults>
</compile_context>

<pallas_src>
import functools

import jax
import jax.numpy as jnp
import numpy as np
from jax.experimental import pallas as pl
from jax.experimental.pallas import tpu as pltpu


def _scaled_mse_kernel(pred_ref, cp_ref, res_ref, out_ref, acc_ref, *,
                       k_pred, k_cp, c_cp, c_res):
    """One (tile_rows, 128) tile per grid step.

    acc_ref : VMEM (8, 128) f32 single-vreg accumulator (per core / per c).
    out_ref : (1, 1, 128) lane-dense partial sum, one block per core.
    """
    i = pl.program_id(1)

    @pl.when(i == 0)
    def _():
        acc_ref[...] = jnp.zeros_like(acc_ref)

    # Upcast after the load: no-op for f32 inputs, cheap VPU cast for bf16.
    pred = pred_ref[...].astype(jnp.float32)
    cp = cp_ref[...].astype(jnp.float32)
    result = res_ref[...].astype(jnp.float32)

    # sigmoid(x) == 0.5*tanh(0.5*x) + 0.5 (one EUP push per sigmoid); the two
    # +0.5 offsets cancel in wdl_pred - wdl_target, so:
    #   diff = 0.5*tanh(pred*k_pred) - (0.5*lambda)*tanh(cp*k_cp)
    #          - (1-lambda)*(result - 0.5)
    diff = (jnp.float32(0.5) * jnp.tanh(pred * jnp.float32(k_pred))
            - jnp.float32(c_cp) * jnp.tanh(cp * jnp.float32(k_cp))
            - jnp.float32(c_res) * (result - jnp.float32(0.5)))
    sq = diff * diff

    # Tree-sum groups of 8 sublanes down to a single (8,128) vreg (pure VPU
    # vreg+vreg adds, no XLU), then a single-vreg VMEM accumulator update.
    acc_ref[...] += jnp.sum(sq.reshape(-1, 8, sq.shape[-1]), axis=0)

    @pl.when(i == pl.num_programs(1) - 1)
    def _():
        # One tiny cross-sublane reduce per core -> lane-dense (1,128) partial.
        out_ref[...] = jnp.sum(acc_ref[...], axis=0)[None, None, :]


def scaled_mse_loss(pred, cp, result, *, lambda_, nnue_2_score, cp_scaling,
                    tile_rows=1024, num_cores=2):
    """Computes ScaledMSELoss over flat vectors of identical length."""
    n = pred.size
    lanes = 128
    assert n % (8 * lanes) == 0, "N must be a multiple of 1024 for this kernel"
    # TODO(synk): no masked tail path; ragged N must be padded by the caller.
    m = n // lanes

    # Split rows across (up to) 2 TensorCores when divisibility allows.  On
    # single-TC chips (v5e/v6e) the extra c-iteration costs only a second
    # accumulator init/finalize and a (1,128) writeback (sub-microsecond).
    if m % (num_cores * 8) != 0:
        num_cores = 1
    rows_per_core = m // num_cores

    # Largest vreg-aligned tile <= tile_rows that divides the per-core rows.
    tr = max(8, min(int(tile_rows), rows_per_core))
    tr -= tr % 8
    while rows_per_core % tr != 0:
        tr -= 8
    steps_per_core = rows_per_core // tr

    # No wrapper upcast: keep caller dtypes (f32 or bf16) to save HBM bytes.
    pred2 = pred.reshape(m, lanes)
    cp2 = cp.reshape(m, lanes)
    res2 = result.reshape(m, lanes)

    in_spec = pl.BlockSpec((tr, lanes),
                           lambda c, i: (c * steps_per_core + i, 0))
    out_spec = pl.BlockSpec((1, 1, lanes), lambda c, i: (c, 0, 0))

    kernel = functools.partial(
        _scaled_mse_kernel,
        k_pred=0.5 * float(nnue_2_score) / float(cp_scaling),
        k_cp=0.5 / float(cp_scaling),
        c_cp=0.5 * float(lambda_),
        c_res=1.0 - float(lambda_),
    )

    bytes_accessed = (pred2.dtype.itemsize + cp2.dtype.itemsize
                      + res2.dtype.itemsize) * n + num_cores * lanes * 4
    cost = pl.CostEstimate(flops=10 * n, transcendentals=2 * n,
                           bytes_accessed=bytes_accessed)

    partials = pl.pallas_call(
        kernel,
        out_shape=jax.ShapeDtypeStruct((num_cores, 1, lanes), jnp.float32),
        grid_spec=pltpu.PrefetchScalarGridSpec(
            num_scalar_prefetch=0,
            grid=(num_cores, steps_per_core),
            in_specs=[in_spec, in_spec, in_spec],
            out_specs=out_spec,
            scratch_shapes=[pltpu.VMEM((8, lanes), jnp.float32)]),
        compiler_params=pltpu.CompilerParams(
            dimension_semantics=("parallel", "arbitrary")),
        cost_estimate=cost,
    )(pred2, cp2, res2)

    # Tiny final reduce over per-core partials + mean, in XLA.
    return jnp.sum(partials) * jnp.float32(1.0 / n)


def _reference(pred, cp, result, *, lambda_, nnue_2_score, cp_scaling):
    wdl_pred = jax.nn.sigmoid(pred * nnue_2_score / cp_scaling)
    wdl_cp = jax.nn.sigmoid(cp / cp_scaling)
    wdl_target = lambda_ * wdl_cp + (1.0 - lambda_) * result
    return jnp.mean((wdl_pred - wdl_target) ** 2)


if __name__ == "__main__":
    # Module hyperparameters (deterministic, in-script).
    lambda_ = 0.7
    nnue_2_score = 600
    cp_scaling = 400

    # Small, tile-friendly batch: N = 2048 positions.
    N = 2048
    key = jax.random.PRNGKey(0)
    k1, k2, k3 = jax.random.split(key, 3)
    pred = jax.random.normal(k1, (N,), dtype=jnp.float32) * 2.0      # raw NNUE eval
    cp = jax.random.normal(k2, (N,), dtype=jnp.float32) * 300.0      # centipawns
    result = jax.random.uniform(k3, (N,), dtype=jnp.float32)         # WDL in [0, 1]

    loss = scaled_mse_loss(
        pred, cp, result,
        lambda_=lambda_, nnue_2_score=nnue_2_score, cp_scaling=cp_scaling)
    loss = jax.block_until_ready(loss)

    ref = _reference(
        pred, cp, result,
        lambda_=lambda_, nnue_2_score=nnue_2_score, cp_scaling=cp_scaling)
    np.testing.assert_allclose(np.asarray(loss), np.asarray(ref),
                               rtol=1e-5, atol=1e-6)

    print("KERNEL_OK")
</pallas_src>

<mosaic_0001>
module attributes {stable_mosaic.version = 11 : i64} {
  func.func @_scaled_mse_kernel(%arg0: i32, %arg1: i32, %arg2: memref<8x128xf32, #tpu.memory_space<vmem>>, %arg3: memref<8x128xf32, #tpu.memory_space<vmem>>, %arg4: memref<8x128xf32, #tpu.memory_space<vmem>>, %arg5: memref<1x1x128xf32, #tpu.memory_space<vmem>>, %arg6: memref<8x128xf32, #tpu.memory_space<vmem>>) attributes {dimension_semantics = [#tpu.dimension_semantics<parallel>, #tpu.dimension_semantics<arbitrary>], iteration_bounds = array<i64: 2, 1>, scalar_prefetch = 0 : i64, scratch_operands = 1 : i64, tpu.core_type = #tpu.core_type<tc>, window_params = [{transform_indices = @transform_0, window_bounds = array<i64: 8, 128>}, {transform_indices = @transform_1, window_bounds = array<i64: 8, 128>}, {transform_indices = @transform_2, window_bounds = array<i64: 8, 128>}, {transform_indices = @transform_3, window_bounds = array<i64: 1, 1, 128>}]} {
    %c0_i32 = arith.constant 0 : i32
    %0 = arith.cmpi eq, %arg1, %c0_i32 : i32
    %1 = arith.extui %0 : i1 to i32
    %c0_i32_0 = arith.constant 0 : i32
    %2 = arith.cmpi ne, %1, %c0_i32_0 : i32
    scf.if %2 {
      %cst_18 = arith.constant 0.000000e+00 : f32
      %31 = vector.broadcast %cst_18 : f32 to vector<8x128xf32>
      %c0_19 = arith.constant 0 : index
      %c0_20 = arith.constant 0 : index
      %32 = vector.load %arg6[%c0_19, %c0_20] : memref<8x128xf32, #tpu.memory_space<vmem>>, vector<8x128xf32>
      tpu.vector_store %arg6[%c0_19, %c0_20], %31 {strides = array<i32>} : memref<8x128xf32, #tpu.memory_space<vmem>>, vector<8x128xf32>,
    } else {
    }
    %c0 = arith.constant 0 : index
    %c0_1 = arith.constant 0 : index
    %3 = vector.load %arg2[%c0, %c0_1] : memref<8x128xf32, #tpu.memory_space<vmem>>, vector<8x128xf32>
    %c0_2 = arith.constant 0 : index
    %c0_3 = arith.constant 0 : index
    %4 = vector.load %arg3[%c0_2, %c0_3] : memref<8x128xf32, #tpu.memory_space<vmem>>, vector<8x128xf32>
    %c0_4 = arith.constant 0 : index
    %c0_5 = arith.constant 0 : index
    %5 = vector.load %arg4[%c0_4, %c0_5] : memref<8x128xf32, #tpu.memory_space<vmem>>, vector<8x128xf32>
    %cst = arith.constant 7.500000e-01 : f32
    %6 = vector.broadcast %cst : f32 to vector<8x128xf32>
    %7 = arith.mulf %3, %6 : vector<8x128xf32>
    %8 = math.tanh %7 : vector<8x128xf32>
    %cst_6 = arith.constant 5.000000e-01 : f32
    %9 = vector.broadcast %cst_6 : f32 to vector<8x128xf32>
    %10 = arith.mulf %9, %8 : vector<8x128xf32>
    %cst_7 = arith.constant 1.250000e-03 : f32
    %11 = vector.broadcast %cst_7 : f32 to vector<8x128xf32>
    %12 = arith.mulf %4, %11 : vector<8x128xf32>
    %13 = math.tanh %12 : vector<8x128xf32>
    %cst_8 = arith.constant 3.500000e-01 : f32
    %14 = vector.broadcast %cst_8 : f32 to vector<8x128xf32>
    %15 = arith.mulf %14, %13 : vector<8x128xf32>
    %16 = arith.subf %10, %15 : vector<8x128xf32>
    %cst_9 = arith.constant 5.000000e-01 : f32
    %17 = vector.broadcast %cst_9 : f32 to vector<8x128xf32>
    %18 = arith.subf %5, %17 : vector<8x128xf32>
    %cst_10 = arith.constant 3.000000e-01 : f32
    %19 = vector.broadcast %cst_10 : f32 to vector<8x128xf32>
    %20 = arith.mulf %19, %18 : vector<8x128xf32>
    %21 = arith.subf %16, %20 : vector<8x128xf32>
    %22 = arith.mulf %21, %21 : vector<8x128xf32>
    %c0_11 = arith.constant 0 : index
    %c0_12 = arith.constant 0 : index
    %23 = vector.load %arg6[%c0_11, %c0_12] : memref<8x128xf32, #tpu.memory_space<vmem>>, vector<8x128xf32>
    %24 = vector.shape_cast %22 : vector<8x128xf32> to vector<1x8x128xf32>
    %cst_13 = arith.constant dense<0.000000e+00> : vector<8x128xf32>
    %25 = vector.multi_reduction <add>, %24, %cst_13 [0] : vector<1x8x128xf32> to vector<8x128xf32>
    %26 = arith.addf %23, %25 : vector<8x128xf32>
    %c0_14 = arith.constant 0 : index
    %c0_15 = arith.constant 0 : index
    %27 = vector.load %arg6[%c0_14, %c0_15] : memref<8x128xf32, #tpu.memory_space<vmem>>, vector<8x128xf32>
    tpu.vector_store %arg6[%c0_14, %c0_15], %26 {strides = array<i32>} : memref<8x128xf32, #tpu.memory_space<vmem>>, vector<8x128xf32>,
    %c0_i32_16 = arith.constant 0 : i32
    %28 = arith.cmpi eq, %arg1, %c0_i32_16 : i32
    %29 = arith.extui %28 : i1 to i32
    %c0_i32_17 = arith.constant 0 : i32
    %30 = arith.cmpi ne, %29, %c0_i32_17 : i32
    scf.if %30 {
      %c0_18 = arith.constant 0 : index
      %c0_19 = arith.constant 0 : index
      %31 = vector.load %arg6[%c0_18, %c0_19] : memref<8x128xf32, #tpu.memory_space<vmem>>, vector<8x128xf32>
      %cst_20 = arith.constant dense<0.000000e+00> : vector<128xf32>
      %32 = vector.multi_reduction <add>, %31, %cst_20 [0] : vector<8x128xf32> to vector<128xf32>
      %33 = vector.shape_cast %32 : vector<128xf32> to vector<1x1x128xf32>
      %c0_21 = arith.constant 0 : index
      %c0_22 = arith.constant 0 : index
      %c0_23 = arith.constant 0 : index
      %34 = vector.load %arg5[%c0_21, %c0_22, %c0_23] : memref<1x1x128xf32, #tpu.memory_space<vmem>>, vector<1x1x128xf32>
      tpu.vector_store %arg5[%c0_21, %c0_22, %c0_23], %33 {strides = array<i32>} : memref<1x1x128xf32, #tpu.memory_space<vmem>>, vector<1x1x128xf32>,
    } else {
    }
    return
  }
  func.func @transform_0(%arg0: i32, %arg1: i32) -> (i32, i32) {
    %c1_i32 = arith.constant 1 : i32
    %0 = arith.muli %arg0, %c1_i32 : i32
    %1 = arith.addi %0, %arg1 : i32
    %c0_i32 = arith.constant 0 : i32
    %c0_i32_0 = arith.constant 0 : i32
    return %1, %c0_i32 : i32, i32
  }
  func.func @transform_1(%arg0: i32, %arg1: i32) -> (i32, i32) {
    %c1_i32 = arith.constant 1 : i32
    %0 = arith.muli %arg0, %c1_i32 : i32
    %1 = arith.addi %0, %arg1 : i32
    %c0_i32 = arith.constant 0 : i32
    %c0_i32_0 = arith.constant 0 : i32
    return %1, %c0_i32 : i32, i32
  }
  func.func @transform_2(%arg0: i32, %arg1: i32) -> (i32, i32) {
    %c1_i32 = arith.constant 1 : i32
    %0 = arith.muli %arg0, %c1_i32 : i32
    %1 = arith.addi %0, %arg1 : i32
    %c0_i32 = arith.constant 0 : i32
    %c0_i32_0 = arith.constant 0 : i32
    return %1, %c0_i32 : i32, i32
  }
  func.func @transform_3(%arg0: i32, %arg1: i32) -> (i32, i32, i32) {
    %c0_i32 = arith.constant 0 : i32
    %c0_i32_0 = arith.constant 0 : i32
    %c0_i32_1 = arith.constant 0 : i32
    return %arg0, %c0_i32, %c0_i32_0 : i32, i32, i32
  }
}

</mosaic_0001>

<bundles_post_ra>
// kernel: tpu_custom_call.1
= control target key start
LH: loop header
LB: loop body
LE: loop exit
PB: predicated region body
PF: predicated region fallthrough
CT: control target
= control target key end

     0   :  { %s928_s0 = inlined_call_operand.hbm [shape: f32[16,128], index: 0, kind: input, shape index: {}]   ;;  %s929_s1 = inlined_call_operand.hbm [shape: f32[16,128], index: 1, kind: input, shape index: {}]   ;;  %s930_s2 = inlined_call_operand.hbm [shape: f32[16,128], index: 2, kind: input, shape index: {}]   ;;  %s931_s3 = inlined_call_operand.hbm [shape: f32[2,1,128], index: 3, kind: output, shape index: {}]  }
   0x1   :  { %935 = sst [smem:[#allocation15_spill]] %s929_s1 }
   0x2   :  { %8 = vsyncpa [#allocation4], 0 }
   0x3   :  { %10 = vsyncpa [#allocation4 + $0x1], 0 }
   0x4   :  { %11 = vsyncpa [#allocation7], 0 }
   0x5   :  { %13 = vsyncpa [#allocation7 + $0x1], 0 }
   0x6   :  { %14 = vsyncpa [#allocation5], 0 }
   0x7   :  { %16 = vsyncpa [#allocation5 + $0x1], 0  ;;  %s735_s12 = smov 0   ;;  %s737_s13 = smov 0  }
   0x8   :  { %s739_s14 = smov 0   ;;  %s741_s15 = smov 0  }
   0x9   :  { %s743_s16 = smov 0   ;;  %s745_s17 = smov 0  }
   0xa LB: > { %936 = sst [smem:[#allocation13_spill]] %s705_s16  ;;  %s766_s18 = sadd.s32 4294967295, %s709_s17   ;;  %s709_s17 = sphi %s745_s17, %s22_s17   ;;  %s705_s16 = sphi %s743_s16, %s948_s16   ;;  %s701_s15 = sphi %s741_s15, %s947_s15   ;;  %s697_s14 = sphi %s739_s14, %s951_s14   ;;  %s693_s13 = sphi %s737_s13, %s950_s13   ;;  %s689_s12 = sphi %s735_s12, %s949_s12  }
   0xb   : > { %s448_s19 = sadd.s32 4294967294, %s709_s17   ;;  %s34_s20 = sadd.s32 1, %s705_s16 }
   0xc   : > { %s43_s21 = sadd.s32 1, %s697_s14  ;;  %p36_p0 = scmp.ge.s32.totalorder %s34_s20, 2 }
   0xd   : > { %p50_p1 = scmp.ne.s32.totalorder %s697_s14, %s693_s13  ;;  %p51_p2 = scmp.eq.s32.totalorder %s709_s17, 0 }
   0xe   : > { %p56_p3 = scmp.ne.s32.totalorder %s693_s13, %s689_s12  ;;  %s953_s20 = smov (%p36_p0, %s34_s20), 0 }
   0xf   : > { %937 = sst [smem:[#allocation14_spill]] %s953_s20  ;;  %p778_p4 = por %p51_p2, %p50_p1 }
  0x10   : > { %p57_p5 = scmp.eq.s32.totalorder %s766_s18, 0  ;;  %s40_s23 = ssub.s32 %s705_s16, %s953_s20 }
  0x11   : > { %p136_p6 = scmp.eq.s32.totalorder %s766_s18, 1  ;;  %p41_p7 = scmp.eq.s32.totalorder %s40_s23, 0 }
  0x12   : > { %p786_p8 = por %p57_p5, %p56_p3  ;;  %p142_p10 = scmp.eq.s32.totalorder %s448_s19, 1 }
  0x13   : > { %p790_p9 = por %p136_p6, %p50_p1  ;;  %p487_p13 = scmp.lt.s32.totalorder %s709_s17, 2 }
  0x14   : > { %s795_s26 = scalar_select %p41_p7, %s697_s14, %s43_s21  }
  0x15   : > { %p797_p11 = por %p142_p10, %p56_p3  ;;  %s932_s28 = sand.u32 1, %s697_s14  }
  0x16   : > { %s806_s29 = sshll.u32 %s932_s28, 3  ;;  %s809_s30 = sshll.u32 %s705_s16, 7 }
  0x17   : > { %p813_p0 = pnand %p487_p13, %p778_p4  ;;  %s181_s5 = sand.u32 1, %s709_s17  }
  0x18   : > { %s943_s1 = sld [smem:[#allocation15_spill]]  ;;  %s185_s9 = scalar_lea.vmem [#allocation6], %s806_s29 }
  0x19   : > { %s193_s10 = sshll.u32 %s185_s9, 4  ;;  %p457_p1 = scmp.ge.s32.totalorder %s709_s17, 1  ;;  %s194_s10 = int_to_ptr.vmem [resolvable:$true] %s193_s10 }
  0x1a   : > { %p217_p2 = scmp.lt.s32.totalorder %s709_s17, 3  ;;  %s825_s11 = scalar_lea.sflag [#allocation7], %s181_s5 }
  0x1b   : > { %p543_p3 = pneg %p813_p0  ;;  %s554_s19 = scalar_lea.vmem %s194_s10, 128 }
  0x1c   : > { %p555_p4 = scmp.ne.s32.totalorder %s194_s10, %s554_s19  ;;  %s711_s21 = smov [#allocation6]  }
  0x1d   : > { %s559_s22 = sshll.u32 %s711_s21, 4  ;;  %s560_s22 = int_to_ptr.vmem [resolvable:$false] %s559_s22 }
  0x1e   : > { %s191_s8 = scalar_lea.hbm %s943_s1, %s809_s30  ;;  %p557_p5 = pnand %p555_p4, %p543_p3 }
  0x1f   : > { %s561_s23 = scalar_lea.vmem %s560_s22, 256  ;;  %p562_p7 = scmp.lt.s32.totalorder %s194_s10, %s560_s22 }
  0x20   : > { %p558_p6 = pneg %p557_p5  ;;  %p563_p10 = scmp.lt.s32.totalorder %s561_s23, %s554_s19 }
  0x22   : > { %p564_p13 = por %p563_p10, %p562_p7 }
  0x24   : > { %p565_p12 = pnand %p564_p13, %p558_p6 }
  0x26   : > { %568 = shalt.err (!%p565_p12)
}
  0x27   : > { %479 = dma.hbm_to_vmem [thread:$0]  (!%p813_p0), %s191_s8, 128, %s194_s10, %s825_s11  }
  0x28   : > { %p839_p4 = pnand %p457_p1, %p217_p2  ;;  %s172_s9 = scalar_lea.hbm %s928_s0, %s809_s30 }
  0x29   : > { %s166_s19 = scalar_lea.vmem [#allocation3], %s806_s29  ;;  %s210_s28 = scalar_lea.hbm %s930_s2, %s809_s30 }
  0x2a   : > { %s174_s21 = sshll.u32 %s166_s19, 4  ;;  %s945_s1 = sand.u32 1, %s697_s14   ;;  %s175_s21 = int_to_ptr.vmem [resolvable:$true] %s174_s21 }
  0x2b   : > { %s163_s20 = scalar_lea.sflag [#allocation4], %s945_s1  ;;  %s582_s8 = scalar_lea.vmem %s175_s21, 128 }
  0x2c   : > { %p583_p12 = scmp.ne.s32.totalorder %s175_s21, %s582_s8  ;;  %s712_s10 = smov [#allocation3]  }
  0x2d   : > { %s587_s16 = sshll.u32 %s712_s10, 4  ;;  %s588_s16 = int_to_ptr.vmem [resolvable:$false] %s587_s16 }
  0x2e   : > { %p585_p1 = pnand %p583_p12, %p543_p3  ;;  %s589_s6 = scalar_lea.vmem %s588_s16, 256 }
  0x2f   : > { %p590_p5 = scmp.lt.s32.totalorder %s175_s21, %s588_s16  ;;  %p591_p6 = scmp.lt.s32.totalorder %s589_s6, %s582_s8 }
  0x30   : > { %p586_p2 = pneg %p585_p1 }
  0x31   : > { %p592_p7 = por %p591_p6, %p590_p5 }
  0x33   : > { %p593_p10 = pnand %p592_p7, %p586_p2 }
  0x35   : > { %596 = shalt.err (!%p593_p10)
}
  0x36   : > { %476 = dma.hbm_to_vmem [thread:$0]  (!%p813_p0), %s172_s9, 128, %s175_s21, %s163_s20  }
  0x37   : > { %s204_s1 = scalar_lea.vmem [#allocation8], %s806_s29  ;;  %s713_s22 = smov [#allocation8]  }
  0x38   : > { %s212_s7 = sshll.u32 %s204_s1, 4  ;;  %s615_s16 = sshll.u32 %s713_s22, 4  ;;  %s213_s7 = int_to_ptr.vmem [resolvable:$true] %s212_s7  ;;  %s616_s16 = int_to_ptr.vmem [resolvable:$false] %s615_s16 }
  0x39   : > { %s610_s19 = scalar_lea.vmem %s213_s7, 128  ;;  %s617_s23 = scalar_lea.vmem %s616_s16, 256 }
  0x3a   : > { %p611_p13 = scmp.ne.s32.totalorder %s213_s7, %s610_s19  ;;  %p618_p2 = scmp.lt.s32.totalorder %s213_s7, %s616_s16 }
  0x3b   : > { %p619_p5 = scmp.lt.s32.totalorder %s617_s23, %s610_s19 }
  0x3c   : > { %p613_p12 = pnand %p611_p13, %p543_p3 }
  0x3d   : > { %p620_p6 = por %p619_p5, %p618_p2 }
  0x3e   : > { %p614_p1 = pneg %p613_p12 }
  0x40   : > { %p621_p7 = pnand %p620_p6, %p614_p1 }
  0x42   : > { %624 = shalt.err (!%p621_p7)
}
  0x43   : > { %482 = dma.hbm_to_vmem [thread:$0]  (!%p813_p0), %s210_s28, 128, %s213_s7, %s825_s11  }
  0x44   : > { %221 = sbr.rel (%p839_p4) target bundleno = 128 (0x80), region = 32  ;;  %s874_s9 = sand.u32 (!%p839_p4), 1, %s693_s13  }
  0x45   : > { %s458_s21 = sshll.u32 (!%p839_p4), %s874_s9, 3  ;;  %s224_s8 = scalar_lea.sflag (!%p839_p4), [#allocation4], %s874_s9 }
  0x46   : > { %s227_s10 = scalar_lea.vmem (!%p839_p4), [#allocation3], %s458_s21 }
  0x49   : > { %676 = dma.done.wait (%p786_p8), %s224_s8, 128  }
  0x4a   : > { %678 = vsyncadd (%p786_p8), %s224_s8, 4294967168  ;;  %s232_s28 = sand.u32 1, %s766_s18   ;;  %s236_s4 = scalar_lea.vmem [#allocation6], %s458_s21 }
  0x4b   : > { %s233_s30 = scalar_lea.sflag [#allocation7], %s232_s28 }
  0x4c   : > { %680 = dma.done.wait (%p786_p8), %s233_s30, 256  }
  0x4d   : > { %682 = vsyncadd (%p786_p8), %s233_s30, 4294967040  ;;  %v285_v0 = vld [vmem:[%s227_s10] sm:$0xff]  ;;  %v286_v1 = vld [vmem:[%s236_s4] sm:$0xff]  ;;  %s245_s11 = scalar_lea.vmem [#allocation8], %s458_s21  ;;  %s276_s18 = scalar_lea.vmem [#allocation9], %s874_s9 }
  0x4e   : > { %v288_v2 = vmul.f32 0.75, %v285_v0  ;;  %v291_v3 = vmul.f32 0.00125, %v286_v1  ;;  %v287_v4 = vld [vmem:[%s245_s11] sm:$0xff]  ;;  %s327_s24 = sshll.u32 %s276_s18, 4  ;;  %s462_s5 = sshll.u32 %s701_s15, 4  ;;  %s328_s24 = int_to_ptr.vmem [resolvable:$true] %s327_s24 }
  0x4f   : > { %v461_v5 = vadd.f32 -0.5, %v287_v4  ;;  %s325_s7 = scalar_lea.hbm %s931_s3, %s462_s5  ;;  %s315_s19 = scalar_lea.sflag [#allocation5], %s874_s9 }
  0x50   : > { %537 = vtanh.f32 %v288_v2  ;;  %s625_s22 = scalar_lea.vmem %s328_s24, 16  ;;  %s714_s16 = smov [#allocation9]  }
  0x51   : > { %539 = vtanh.f32 %v291_v3  ;;  %v296_v10 = vmul.f32 0.3, %v461_v5  ;;  %p626_p8 = scmp.ne.s32.totalorder %s328_s24, %s625_s22  ;;  %s629_s23 = sshll.u32 %s714_s16, 4  ;;  %s630_s23 = int_to_ptr.vmem [resolvable:$false] %s629_s23 }
  0x52   : > { %s631_s20 = scalar_lea.vmem %s630_s23, 32  ;;  %p632_p4 = scmp.lt.s32.totalorder %s328_s24, %s630_s23 }
  0x53   : > { %p627_p0 = pnand %p626_p8, %p790_p9  ;;  %p633_p10 = scmp.lt.s32.totalorder %s631_s20, %s625_s22 }
  0x55   : > { %p628_p3 = pneg %p627_p0  ;;  %p634_p13 = por %p633_p10, %p632_p4 }
  0x57   : > { %p635_p12 = pnand %p634_p13, %p628_p3 }
  0x5d   : > { %v538_v6 = vpop.eup %537 }
  0x5e   : > { %v540_v7 = vpop.eup %539  ;;  %v290_v8 = vmul.f32 0.5, %v538_v6 }
  0x5f   : > { %v293_v9 = vmul.f32 0.35, %v540_v7 }
  0x61   : > { %v294_v11 = vsub.f32 %v290_v8, %v293_v9 }
  0x63   : > { %v297_v12 = vsub.f32 %v294_v11, %v296_v10 }
  0x65   : > { %v298_v13 = vmul.f32 %v297_v12, %v297_v12 }
  0x67   : > { %v307_v14 = vrot.slane %v298_v13, 4 }
  0x69   : > { %v308_v15 = vadd.f32 %v307_v14, %v298_v13 }
  0x6b   : > { %v309_v16 = vrot.slane %v308_v15, 2 }
  0x6d   : > { %v310_v17 = vadd.f32 %v309_v16, %v308_v15 }
  0x6f   : > { %v311_v18 = vrot.slane %v310_v17, 1 }
  0x71   : > { %v312_v19 = vadd.f32 %v311_v18, %v310_v17 }
  0x73   : > { %313 = vst [vmem:[%s276_s18] sm:$0x1] %v312_v19 }
  0x74   : > { %638 = shalt.err (!%p635_p12)
}
  0x75   : > { %s639_s15 = scalar_lea.hbm %s325_s7, 16  ;;  %s643_s21 = scalar_lea.hbm %s931_s3, 32 }
  0x76   : > { %p640_p1 = scmp.ne.s32.totalorder %s325_s7, %s639_s15  ;;  %p644_p6 = scmp.lt.s32.totalorder %s325_s7, %s931_s3 }
  0x77   : > { %p645_p7 = scmp.lt.s32.totalorder %s643_s21, %s639_s15 }
  0x78   : > { %p641_p2 = pnand %p640_p1, %p790_p9 }
  0x79   : > { %p646_p8 = por %p645_p7, %p644_p6 }
  0x7a   : > { %p642_p5 = pneg %p641_p2 }
  0x7c   : > { %p647_p0 = pnand %p646_p8, %p642_p5 }
  0x7e   : > { %650 = shalt.err (!%p647_p0)
}
  0x7f   : > { %471 = dma.vmem_to_hbm [thread:$0]  (%p790_p9), %s328_s24, 16, %s325_s7, %s315_s19  }
  0x80 PF: > { %s339_s28 = sand.u32 1, %s689_s12   ;;  %p946_p3 = scmp.ge.s32.totalorder %s709_s17, 2 }
  0x81   : > { %s340_s30 = scalar_lea.sflag [#allocation5], %s339_s28 }
  0x82   : > { %p484_p4 = pnand %p946_p3, %p797_p11 }
  0x84   : > { %p485_p10 = pneg %p484_p4 }
  0x86   : > { %684 = dma.done.wait (%p485_p10), %s340_s30, 16  }
  0x87   : > { %686 = vsyncadd (%p485_p10), %s340_s30, 4294967280  ;;  %s22_s17 = sadd.s32 1, %s709_s17   ;;  %s947_s15 = sld [smem:[#allocation13_spill]] }
  0x88   : > { %p19_p13 = scmp.ge.s32.totalorder %s22_s17, 4   ;;  %s948_s16 = sld [smem:[#allocation14_spill]] }
  0x89   : > { %s949_s12 = smov %s693_s13  ;;  %s950_s13 = smov %s697_s14 }
  0x8a   : > { %s951_s14 = smov %s795_s26  ;;  %21 = sbr.rel (!%p19_p13) target bundleno = 10 (0xa), region = 109 }
  0x8f   :  { %344 = vsyncpa [#allocation4], 1 }
  0x90   :  { %346 = vsyncpa [#allocation4 + $0x1], 1 }
  0x91   :  { %347 = vsyncpa [#allocation7], 1 }
  0x92   :  { %349 = vsyncpa [#allocation7 + $0x1], 1 }
  0x93   :  { %350 = vsyncpa [#allocation5], 1 }
  0x94   :  { %352 = vsyncpa [#allocation5 + $0x1], 1 }

</bundles_post_ra>
